<compile_context>
chip_gen: v6e
topology: v6e:2x2x1
jax: 0.10.0
libtpu: 0.0.40
codegen_flags: <defaults>
</compile_context>

<pallas_src>
import jax
import jax.numpy as jnp
from jax.experimental import pallas as pl
from jax.experimental.pallas import tpu as pltpu  # noqa: F401  (TPU backend)


def _round_up(x: int, m: int) -> int:
    return (x + m - 1) // m * m


# ----------------------------- Pallas kernel -------------------------------
def _fused_forward_kernel(x_ref, enc_w_ref, cls_w_ref, cls_b_ref, o_ref):
    # x_ref:     [Bp, C, HW]  encoder feature map, spatial flattened
    # enc_w_ref: [C,  Dp]     encoder projection weight
    # cls_w_ref: [Dp, NCp]    classifier weight (pre-transposed)
    # cls_b_ref: [1,  NCp]    classifier bias
    # o_ref:     [Bp, NCp]    logits
    pooled = jnp.mean(x_ref[...], axis=-1)                     # [Bp, C]  (XLU)
    proj = jnp.dot(pooled, enc_w_ref[...],
                   preferred_element_type=jnp.float32)          # [Bp, Dp] (MXU)
    logits = jnp.dot(proj, cls_w_ref[...],
                     preferred_element_type=jnp.float32)        # [Bp, NCp](MXU)
    o_ref[...] = (logits + cls_b_ref[...]).astype(o_ref.dtype)  # f32 bias add


# ------------------------------ host wrapper --------------------------------
def linear_classifier_forward(x, enc_w, cls_w_t, cls_b):
    """logits = ((global_avg_pool(x) @ enc_w) @ cls_w_t) + cls_b, one kernel.

    Stands in for: proj, pred = encoder(x); return self.linear(proj).
    TODO(synk): the real encoder is an arbitrary injected nn.Module; only its
    pooling + dense-projection stand-in is modeled here.
    """
    B, C, H, W = x.shape
    HW = H * W
    D = enc_w.shape[1]
    NC = cls_w_t.shape[1]

    Bp = _round_up(B, 8)        # sublane multiple for the output/M dim
    Dp = _round_up(D, 128)      # lane-dense intermediate width
    NCp = _round_up(NC, 128)    # lane-dense output width (unmasked stores)

    x3 = jnp.pad(x.reshape(B, C, HW).astype(jnp.float32),
                 ((0, Bp - B), (0, 0), (0, 0)))
    enc_w_p = jnp.pad(enc_w.astype(jnp.float32), ((0, 0), (0, Dp - D)))
    cls_w_p = jnp.pad(cls_w_t.astype(jnp.float32), ((0, Dp - D), (0, NCp - NC)))
    cls_b_p = jnp.pad(cls_b.astype(jnp.float32), (0, NCp - NC)).reshape(1, NCp)

    out_p = pl.pallas_call(
        _fused_forward_kernel,
        out_shape=jax.ShapeDtypeStruct((Bp, NCp), jnp.float32),
        # Single block == full (padded) array: ~32 KiB of VMEM total at these
        # sizes, so no grid / pipelining is needed.
        in_specs=[
            pl.BlockSpec((Bp, C, HW), lambda: (0, 0, 0)),
            pl.BlockSpec((C, Dp), lambda: (0, 0)),
            pl.BlockSpec((Dp, NCp), lambda: (0, 0)),
            pl.BlockSpec((1, NCp), lambda: (0, 0)),
        ],
        out_specs=pl.BlockSpec((Bp, NCp), lambda: (0, 0)),
    )(x3, enc_w_p, cls_w_p, cls_b_p)

    return out_p[:B, :NC]


# --------------------------------- main -------------------------------------
if __name__ == "__main__":
    B, C, H, W = 2, 4, 16, 16      # input image shape (NCHW)
    D = 32                         # encoder hidden / proj width
    NUM_CLASSES = 10

    key = jax.random.PRNGKey(0)
    k_x, k_enc, k_w, k_b = jax.random.split(key, 4)

    x = jax.random.normal(k_x, (B, C, H, W), dtype=jnp.float32)
    enc_w = jax.random.normal(k_enc, (C, D), dtype=jnp.float32) * 0.1
    # nn.Linear(D, NUM_CLASSES): weight [NUM_CLASSES, D], bias [NUM_CLASSES].
    # Stored pre-transposed as [D, NUM_CLASSES] for the kernel.
    cls_w_t = jax.random.normal(k_w, (D, NUM_CLASSES), dtype=jnp.float32) * 0.1
    cls_b = jax.random.normal(k_b, (NUM_CLASSES,), dtype=jnp.float32) * 0.1

    fwd = jax.jit(linear_classifier_forward)
    out = jax.block_until_ready(fwd(x, enc_w, cls_w_t, cls_b))

    # sanity check against plain-JAX reference (pool -> proj -> linear, no sigmoid)
    pooled_ref = jnp.mean(x, axis=(2, 3))
    ref = (pooled_ref @ enc_w) @ cls_w_t + cls_b
    assert out.shape == (B, NUM_CLASSES)
    assert jnp.allclose(out, ref, atol=1e-4, rtol=1e-4)

    print("KERNEL_OK")
</pallas_src>

<mosaic_0001>
module attributes {stable_mosaic.version = 11 : i64} {
  func.func @_fused_forward_kernel(%arg0: memref<8x4x256xf32, #tpu.memory_space<vmem>>, %arg1: memref<4x128xf32, #tpu.memory_space<vmem>>, %arg2: memref<128x128xf32, #tpu.memory_space<vmem>>, %arg3: memref<1x128xf32, #tpu.memory_space<vmem>>, %arg4: memref<8x128xf32, #tpu.memory_space<vmem>>) attributes {dimension_semantics = [], scalar_prefetch = 0 : i64, scratch_operands = 0 : i64, tpu.core_type = #tpu.core_type<tc>} {
    %c0 = arith.constant 0 : index
    %c0_0 = arith.constant 0 : index
    %c0_1 = arith.constant 0 : index
    %0 = vector.load %arg0[%c0, %c0_0, %c0_1] : memref<8x4x256xf32, #tpu.memory_space<vmem>>, vector<8x4x256xf32>
    %cst = arith.constant dense<0.000000e+00> : vector<8x4xf32>
    %1 = vector.multi_reduction <add>, %0, %cst [2] : vector<8x4x256xf32> to vector<8x4xf32>
    %cst_2 = arith.constant 2.560000e+02 : f32
    %2 = vector.broadcast %cst_2 : f32 to vector<8x4xf32>
    %3 = arith.divf %1, %2 : vector<8x4xf32>
    %c0_3 = arith.constant 0 : index
    %c0_4 = arith.constant 0 : index
    %4 = vector.load %arg1[%c0_3, %c0_4] : memref<4x128xf32, #tpu.memory_space<vmem>>, vector<4x128xf32>
    %cst_5 = arith.constant dense<0.000000e+00> : vector<8x128xf32>
    %5 = tpu.matmul %3, %4, %cst_5 {dimension_numbers = #tpu.dot_dimension_numbers<[1], [0], [0], [1], [0, 0, 1, 1], [], []>} : vector<8x4xf32>, vector<4x128xf32>, vector<8x128xf32> -> vector<8x128xf32>
    %c0_6 = arith.constant 0 : index
    %c0_7 = arith.constant 0 : index
    %6 = vector.load %arg2[%c0_6, %c0_7] : memref<128x128xf32, #tpu.memory_space<vmem>>, vector<128x128xf32>
    %cst_8 = arith.constant dense<0.000000e+00> : vector<8x128xf32>
    %7 = tpu.matmul %5, %6, %cst_8 {dimension_numbers = #tpu.dot_dimension_numbers<[1], [0], [0], [1], [0, 0, 1, 1], [], []>} : vector<8x128xf32>, vector<128x128xf32>, vector<8x128xf32> -> vector<8x128xf32>
    %c0_9 = arith.constant 0 : index
    %c0_10 = arith.constant 0 : index
    %8 = vector.load %arg3[%c0_9, %c0_10] : memref<1x128xf32, #tpu.memory_space<vmem>>, vector<1x128xf32>
    %9 = vector.broadcast %8 : vector<1x128xf32> to vector<8x128xf32>
    %10 = arith.addf %7, %9 : vector<8x128xf32>
    %c0_11 = arith.constant 0 : index
    %c0_12 = arith.constant 0 : index
    %11 = vector.load %arg4[%c0_11, %c0_12] : memref<8x128xf32, #tpu.memory_space<vmem>>, vector<8x128xf32>
    tpu.vector_store %arg4[%c0_11, %c0_12], %10 {strides = array<i32>} : memref<8x128xf32, #tpu.memory_space<vmem>>, vector<8x128xf32>,
    return
  }
}

</mosaic_0001>

<bundles_post_ra>
// kernel: linear_classifier_forward.1
= control target key start
LH: loop header
LB: loop body
LE: loop exit
PB: predicated region body
PF: predicated region fallthrough
CT: control target
= control target key end

     0   :  { %vm49_vm0 = vcmask 1043456   ;;  %v402_v40 = vmov 0.0   ;;  %vm403_vm1 = vmmov 0   ;;  %v108_v57 = vlaneseq  ;;  %s527_s0 = inlined_call_operand.vmem [shape: f32[8,4,256], index: 0, kind: input, shape index: {}]   ;;  %s528_s1 = inlined_call_operand.vmem [shape: f32[4,128], index: 1, kind: input, shape index: {}]   ;;  %s529_s2 = inlined_call_operand.vmem [shape: f32[128,128], index: 2, kind: input, shape index: {}]   ;;  %s530_s3 = inlined_call_operand.vmem [shape: f32[1,128], index: 3, kind: input, shape index: {}]   ;;  %s531_s4 = inlined_call_operand.vmem [shape: f32[8,128], index: 4, kind: output, shape index: {}]  }
   0x1   :  { %v17_v0 = vld [vmem:[%s527_s0] sm:$0xff]  ;;  %v19_v1 = vld [vmem:[%s527_s0 + $0x10] sm:$0xff]  ;;  %v18_v2 = vld [vmem:[%s527_s0 + $0x8] sm:$0xff]  ;;  %352 = vmatprep.subr.mxu0 %v402_v40  ;;  %354 = vmatprep.mubr.msk.f32.mxu0 %vm403_vm1, %v402_v40  ;;  %vm142_vm2 = vcmask 1041409   ;;  %vm144_vm3 = vcmask 1042434   ;;  %vm146_vm4 = vcmask 1043459  }
   0x2   :  { %v33_v3 = vcombine.high %v17_v0, %v17_v0  ;;  %v50_v4 = vsel %vm49_vm0, %v17_v0, 0.0  ;;  %v35_v5 = vcombine.high %v19_v1, %v19_v1  ;;  %v60_v6 = vsel %vm49_vm0, %v19_v1, 0.0  ;;  %v20_v7 = vld [vmem:[%s527_s0 + $0x18] sm:$0xff]  ;;  %v21_v8 = vld [vmem:[%s527_s0 + $0x20] sm:$0xff]  ;;  %v22_v12 = vld [vmem:[%s527_s0 + $0x28] sm:$0xff]  ;;  %357 = vmatprep.subr.mxu1 %v402_v40  ;;  %389 = vmatprep.mubr.msk.f32.mxu1 %vm403_vm1, %v402_v40 }
   0x3   :  { %v34_v9 = vcombine.high %v18_v2, %v18_v2  ;;  %v55_v10 = vsel %vm49_vm0, %v18_v2, 0.0  ;;  %v36_v11 = vcombine.high %v20_v7, %v20_v7  ;;  %v65_v15 = vsel %vm49_vm0, %v20_v7, 0.0  ;;  %v23_v21 = vld [vmem:[%s527_s0 + $0x30] sm:$0xff]  ;;  %v24_v22 = vld [vmem:[%s527_s0 + $0x38] sm:$0xff]  ;;  %v99_v41 = vld [vmem:[%s528_s1] sm:$0xf] }
   0x4   :  { %v51_v13 = vsel %vm49_vm0, %v33_v3, 0.0  ;;  %v61_v14 = vsel %vm49_vm0, %v35_v5, 0.0  ;;  %v37_v16 = vcombine.high %v21_v8, %v21_v8  ;;  %v38_v23 = vcombine.high %v22_v12, %v22_v12  ;;  %353 = vmatpush3.msk.msra.mxu0 %vm49_vm0, %v99_v41  ;;  %v247_v42 = vld [vmem:[%s529_s2 + $0x78] sm:$0xff]  ;;  %v246_v43 = vld [vmem:[%s529_s2 + $0x70] sm:$0xff]  ;;  %v245_v44 = vld [vmem:[%s529_s2 + $0x68] sm:$0xff] }
   0x5   :  { %v52_v17 = vadd.f32 %v51_v13, %v50_v4  ;;  %v62_v18 = vadd.f32 %v61_v14, %v60_v6  ;;  %v56_v19 = vsel %vm49_vm0, %v34_v9, 0.0  ;;  %v66_v20 = vsel %vm49_vm0, %v36_v11, 0.0  ;;  %358 = vmatpush3.msra.mxu1 %v247_v42  ;;  %v244_v45 = vld [vmem:[%s529_s2 + $0x60] sm:$0xff]  ;;  %v243_v46 = vld [vmem:[%s529_s2 + $0x58] sm:$0xff]  ;;  %v242_v47 = vld [vmem:[%s529_s2 + $0x50] sm:$0xff] }
   0x6   :  { %v57_v24 = vadd.f32 %v56_v19, %v55_v10  ;;  %v67_v25 = vadd.f32 %v66_v20, %v65_v15  ;;  %v70_v26 = vsel %vm49_vm0, %v21_v8, 0.0  ;;  %v71_v27 = vsel %vm49_vm0, %v37_v16, 0.0  ;;  %359 = vmatprep.subr.mxu1 %v402_v40  ;;  %v241_v48 = vld [vmem:[%s529_s2 + $0x48] sm:$0xff]  ;;  %v240_v49 = vld [vmem:[%s529_s2 + $0x40] sm:$0xff]  ;;  %v239_v50 = vld [vmem:[%s529_s2 + $0x38] sm:$0xff] }
   0x7   :  { %53 = vadd.xlane.f32.xlu0 %v52_v17  ;;  %63 = vadd.xlane.f32.xlu1 %v62_v18  ;;  %v75_v28 = vsel %vm49_vm0, %v22_v12, 0.0  ;;  %v76_v29 = vsel %vm49_vm0, %v38_v23, 0.0  ;;  %v39_v30 = vcombine.high %v23_v21, %v23_v21  ;;  %v40_v31 = vcombine.high %v24_v22, %v24_v22  ;;  %v238_v51 = vld [vmem:[%s529_s2 + $0x30] sm:$0xff]  ;;  %v237_v52 = vld [vmem:[%s529_s2 + $0x28] sm:$0xff]  ;;  %v236_v53 = vld [vmem:[%s529_s2 + $0x20] sm:$0xff] }
   0x8   :  { %v72_v32 = vadd.f32 %v71_v27, %v70_v26  ;;  %v77_v33 = vadd.f32 %v76_v29, %v75_v28  ;;  %v80_v34 = vsel %vm49_vm0, %v23_v21, 0.0  ;;  %v85_v36 = vsel %vm49_vm0, %v24_v22, 0.0  ;;  %360 = vmatpush3.msra.mxu1 %v246_v43  ;;  %v235_v54 = vld [vmem:[%s529_s2 + $0x18] sm:$0xff]  ;;  %v234_v55 = vld [vmem:[%s529_s2 + $0x10] sm:$0xff]  ;;  %v233_v56 = vld [vmem:[%s529_s2 + $0x8] sm:$0xff] }
   0x9   :  { %v81_v35 = vsel %vm49_vm0, %v39_v30, 0.0  ;;  %v86_v37 = vsel %vm49_vm0, %v40_v31, 0.0  ;;  %361 = vmatprep.subr.mxu1 %v402_v40  ;;  %v109_v58 = vand.u32 127, %v108_v57  ;;  %v111_v59 = vshrl.u32 %v108_v57, 7  ;;  %v232_v28 = vld [vmem:[%s529_s2] sm:$0xff] }
   0xa   :  { %v82_v38 = vadd.f32 %v81_v35, %v80_v34  ;;  %v87_v39 = vadd.f32 %v86_v37, %v85_v36  ;;  %362 = vmatpush3.msra.mxu1 %v245_v44  ;;  %vm148_vm5 = vcmask 1044484   ;;  %vm150_vm6 = vcmask 1045509   ;;  %v332_v31 = vld [vmem:[%s530_s3] ss:$0 sm:$0xff] }
   0xb   :  { %58 = vadd.xlane.f32.xlu0 %v57_v24  ;;  %68 = vadd.xlane.f32.xlu1 %v67_v25  ;;  %v112_v62 = vsub.s32 %v109_v58, %v111_v59  ;;  %vm152_vm7 = vcmask 1046534   ;;  %vm154_vm8 = vcmask 1047559   ;;  %vm156_vm9 = vcmask 31744  }
   0xc   :  { %363 = vmatprep.subr.mxu1 %v402_v40 }
   0xd   :  { %364 = vmatpush3.msra.mxu1 %v244_v45 }
   0xe   :  { %365 = vmatprep.subr.mxu1 %v402_v40 }
   0xf   :  { %73 = vadd.xlane.f32.xlu0 %v72_v32  ;;  %78 = vadd.xlane.f32.xlu1 %v77_v33 }
  0x10   :  { %366 = vmatpush3.msra.mxu1 %v243_v46 }
  0x11   :  { %367 = vmatprep.subr.mxu1 %v402_v40 }
  0x12   :  { %368 = vmatpush3.msra.mxu1 %v242_v47 }
  0x13   :  { %83 = vadd.xlane.f32.xlu0 %v82_v38  ;;  %88 = vadd.xlane.f32.xlu1 %v87_v39 }
  0x14   :  { %369 = vmatprep.subr.mxu1 %v402_v40 }
  0x15   :  { %370 = vmatpush3.msra.mxu1 %v241_v48 }
  0x16   :  { %371 = vmatprep.subr.mxu1 %v402_v40 }
  0x17   :  { %372 = vmatpush3.msra.mxu1 %v240_v49 }
  0x18   :  { %373 = vmatprep.subr.mxu1 %v402_v40 }
  0x19   :  { %374 = vmatpush3.msra.mxu1 %v239_v50 }
  0x1a   :  { %375 = vmatprep.subr.mxu1 %v402_v40 }
  0x1b   :  { %376 = vmatpush3.msra.mxu1 %v238_v51 }
  0x1c   :  { %377 = vmatprep.subr.mxu1 %v402_v40 }
  0x1d   :  { %378 = vmatpush3.msra.mxu1 %v237_v52 }
  0x1e   :  { %379 = vmatprep.subr.mxu1 %v402_v40 }
  0x1f   :  { %380 = vmatpush3.msra.mxu1 %v236_v53 }
  0x20   :  { %381 = vmatprep.subr.mxu1 %v402_v40 }
  0x21   :  { %382 = vmatpush3.msra.mxu1 %v235_v54 }
  0x22   :  { %383 = vmatprep.subr.mxu1 %v402_v40 }
  0x23   :  { %384 = vmatpush3.msra.mxu1 %v234_v55 }
  0x24   :  { %385 = vmatprep.subr.mxu1 %v402_v40 }
  0x25   :  { %386 = vmatpush3.msra.mxu1 %v233_v56 }
  0x26   :  { %387 = vmatprep.subr.mxu1 %v402_v40 }
  0x27   :  { %388 = vmatpush3.msra.mxu1 %v232_v28 }
  0x90   :  { %v54_v60 = vpop.xlane.xlu0 %53  ;;  %v64_v61 = vpop.xlane.xlu1 %63 }
  0x91   :  { %v91_v63 = vmul.f32 0.00390625, %v54_v60  ;;  %v93_v0 = vmul.f32 0.00390625, %v64_v61 }
  0x93   :  { %v113_v5 = vrot.slane %v91_v63, %v112_v62  ;;  %v121_v8 = vrot.slane %v93_v0, %v112_v62 }
  0x94   :  { %v59_v1 = vpop.xlane.xlu0 %58  ;;  %v69_v2 = vpop.xlane.xlu1 %68 }
  0x95   :  { %v92_v3 = vmul.f32 0.00390625, %v59_v1  ;;  %v94_v4 = vmul.f32 0.00390625, %v69_v2 }
  0x97   :  { %v117_v6 = vrot.slane %v92_v3, %v112_v62  ;;  %v125_v7 = vrot.slane %v94_v4, %v112_v62 }
  0x98   :  { %v74_v9 = vpop.xlane.xlu0 %73  ;;  %v79_v10 = vpop.xlane.xlu1 %78 }
  0x99   :  { %v143_v11 = vsel %vm142_vm2, %v117_v6, %v113_v5  ;;  %v95_v12 = vmul.f32 0.00390625, %v74_v9  ;;  %v96_v13 = vmul.f32 0.00390625, %v79_v10 }
  0x9a   :  { %v145_v14 = vsel %vm144_vm3, %v121_v8, %v143_v11 }
  0x9b   :  { %v147_v15 = vsel %vm146_vm4, %v125_v7, %v145_v14  ;;  %v129_v16 = vrot.slane %v95_v12, %v112_v62  ;;  %v133_v17 = vrot.slane %v96_v13, %v112_v62 }
  0x9c   :  { %v84_v18 = vpop.xlane.xlu0 %83  ;;  %v89_v19 = vpop.xlane.xlu1 %88 }
  0x9d   :  { %v149_v20 = vsel %vm148_vm5, %v129_v16, %v147_v15  ;;  %v97_v21 = vmul.f32 0.00390625, %v84_v18  ;;  %v98_v22 = vmul.f32 0.00390625, %v89_v19 }
  0x9e   :  { %v151_v25 = vsel %vm150_vm6, %v133_v17, %v149_v20 }
  0x9f   :  { %v137_v23 = vrot.slane %v97_v21, %v112_v62  ;;  %v141_v24 = vrot.slane %v98_v22, %v112_v62 }
  0xa1   :  { %v153_v26 = vsel %vm152_vm7, %v137_v23, %v151_v25 }
  0xa2   :  { %v155_v27 = vsel %vm154_vm8, %v141_v24, %v153_v26 }
  0xa3   :  { %355 = vmatmul.mubr.msk.f32.vlgmr.msra.gmra.mxu0 %vm156_vm9, %v155_v27 }
 0x163   :  { %v228_v29 = vpop.f32.mrf.mxu0 }
 0x164   :  { %390 = vmatmul.mubr.f32.vlgmr.msra.gmra.mxu1 %v228_v29 }
 0x165   :  { %v356_v30 = vpop.f32.mrf.mxu0 }
 0x224   :  { %v321_v32 = vpop.f32.mrf.mxu1 }
 0x225   :  { %v322_v33 = vadd.f32 %v332_v31, %v321_v32 }
 0x226   :  { %v391_v34 = vpop.f32.mrf.mxu1 }
 0x227   :  { %325 = vst [vmem:[%s531_s4] sm:$0xff] %v322_v33 }

</bundles_post_ra>
